<compile_context>
chip_gen: v5e
topology: v5e:2x2
jax: 0.10.0
libtpu: 0.0.40
codegen_flags: <defaults>
</compile_context>

<pallas_src>
import functools

import jax
import jax.numpy as jnp
from jax.experimental import pallas as pl
from jax.experimental.pallas import tpu as pltpu


_VMEM_LIMIT = 32 * 1024 * 1024   # safe on v5e/v6e (128 MiB phys) and v7x (64 MiB)
_EW_MAX_TILE = 2048              # max rows per elementwise grid step


def _round_up(x, m):
    return (x + m - 1) // m * m


def _pick_tile(size, max_tile, granule):
    """Largest tile <= max_tile, multiple of `granule`, dividing the padded
    size.  Returns (tile, padded_size)."""
    p = _round_up(size, granule)
    if p <= max_tile:
        return p, p
    q = p // granule
    for cand in range(max_tile // granule, 0, -1):
        if q % cand == 0:
            return cand * granule, p
    return granule, p


def _mm_m_tiling(m):
    """Row tiling for the matmul: <=256 rows/step (keeps >=2 grid steps on the
    large layers so both v7x TensorCores get work), 16-row granule (bf16)."""
    if m <= 256:
        mp = _round_up(m, 8)
        return mp, mp
    mp = _round_up(m, 16)
    q = mp // 16
    for cand in range(256 // 16, 0, -1):
        if q % cand == 0:
            return cand * 16, mp
    return 16, mp


# ----------------------------------------------------------------------------
# Matmul kernels (regular convs via JAX im2col) with fused BN statistics
# ----------------------------------------------------------------------------
def _mm_kernel(a_ref, b_ref, o_ref):
    o_ref[...] = jnp.dot(a_ref[...], b_ref[...],
                         preferred_element_type=jnp.float32).astype(o_ref.dtype)


def _mm_stats_kernel(a_ref, b_ref, o_ref, s_ref):
    acc = jnp.dot(a_ref[...], b_ref[...], preferred_element_type=jnp.float32)
    s_ref[0, 0:1, :] = jnp.sum(acc, axis=0, keepdims=True)
    s_ref[0, 1:2, :] = jnp.sum(acc * acc, axis=0, keepdims=True)
    o_ref[...] = acc.astype(o_ref.dtype)


def pallas_matmul(a, b, *, want_stats=False, out_dtype=jnp.float32):
    """(M, K) @ (K, N).  bf16 operands on the MXU, f32 accumulation, full-K
    block (no K padding/copy), single lane-dense N block, 1-D grid over M.
    Optionally also returns per-column (sum, sum-of-squares) of the output."""
    m, k = a.shape
    k2, n = b.shape
    assert k == k2
    tm, mp = _mm_m_tiling(m)
    kp = _round_up(k, 16)            # only pads the tiny-K layers (K=27/72)
    np_ = _round_up(n, 128)          # lane-dense weight / output columns
    a_p = a.astype(jnp.bfloat16)
    if (mp, kp) != (m, k):
        a_p = jnp.pad(a_p, ((0, mp - m), (0, kp - k)))
    b_p = b.astype(jnp.bfloat16)
    if (kp, np_) != (k, n):
        b_p = jnp.pad(b_p, ((0, kp - k), (0, np_ - n)))
    g = mp // tm
    cost = pl.CostEstimate(
        flops=2 * mp * np_ * kp, transcendentals=0,
        bytes_accessed=(a_p.size * 2 + b_p.size * 2
                        + mp * np_ * jnp.dtype(out_dtype).itemsize))
    cparams = pltpu.CompilerParams(dimension_semantics=("parallel",),
                                   vmem_limit_bytes=_VMEM_LIMIT)
    a_spec = pl.BlockSpec((tm, kp), lambda i: (i, 0))
    b_spec = pl.BlockSpec((kp, np_), lambda i: (0, 0))   # resident weight block
    o_spec = pl.BlockSpec((tm, np_), lambda i: (i, 0))
    if want_stats:
        out, st = pl.pallas_call(
            _mm_stats_kernel,
            out_shape=(jax.ShapeDtypeStruct((mp, np_), out_dtype),
                       jax.ShapeDtypeStruct((g, 2, np_), jnp.float32)),
            grid=(g,),
            in_specs=[a_spec, b_spec],
            out_specs=(o_spec, pl.BlockSpec((1, 2, np_), lambda i: (i, 0, 0))),
            compiler_params=cparams,
            cost_estimate=cost,
        )(a_p, b_p)
        st = jnp.sum(st, axis=0)                     # zero-padded rows add 0
        return out[:m, :n], (st[0, :n], st[1, :n])
    out = pl.pallas_call(
        _mm_kernel,
        out_shape=jax.ShapeDtypeStruct((mp, np_), out_dtype),
        grid=(g,),
        in_specs=[a_spec, b_spec],
        out_specs=o_spec,
        compiler_params=cparams,
        cost_estimate=cost,
    )(a_p, b_p)
    return out[:m, :n], None


# ----------------------------------------------------------------------------
# Fused-tap stride-2 transpose-conv kernel (sub-pixel phase decomposition)
# ----------------------------------------------------------------------------
def _deconv_kernel(x_ref, h_ref, w_ref, o_ref, s_ref, *, ti, w_out):
    """One (image, row-block) step of ConvTranspose2d(k=3, s=2, p=1, op=1).

    x_ref: (1, ti, Wpad, Ci)  rows i0..i0+ti-1 of the end-padded input.
    h_ref: (1, 1,  Wpad, Ci)  halo row i0+ti.
    w_ref: (2, Ci, 2*Co4)     per row-tap di weights, columns [dj=0 | dj=1],
                              Co4 = 4*Co ordered by output phase (a, b).
    o_ref: (1, ti, W, Co4)    phase-blocked output rows.
    s_ref: (1, 2, Co4)        per-column sum / sum-of-squares of the f32 acc.
    """
    W = w_out
    xm = x_ref[0]                                    # (ti, Wpad, Ci)
    xh = h_ref[0]                                    # (1,  Wpad, Ci)
    rows = jnp.concatenate([xm, xh], axis=0)         # (ti+1, Wpad, Ci)
    wpad = xm.shape[1]
    ci = xm.shape[2]
    co4 = o_ref.shape[3]

    acc = None
    for di in (0, 1):
        seg = rows[di:di + ti].reshape(ti * wpad, ci)
        p = jnp.dot(seg, w_ref[di], preferred_element_type=jnp.float32)
        p = p.reshape(ti, wpad, 2 * co4)
        part = p[:, 0:W, 0:co4] + p[:, 1:W + 1, co4:2 * co4]
        acc = part if acc is None else acc + part    # (ti, W, Co4) f32

    colsum = jnp.sum(acc, axis=0)                                   # (W, Co4)
    s_ref[0, 0:1, :] = jnp.sum(colsum, axis=0, keepdims=True)
    s_ref[0, 1:2, :] = jnp.sum(jnp.sum(acc * acc, axis=0), axis=0,
                               keepdims=True)
    o_ref[0] = acc.astype(o_ref.dtype)


def _conv_transpose_weight_matrix(w_ciohw):
    """Phase-blocked weight matrix for ConvTranspose2d(k=3, s=2, p=1, op=1).

    Rows: the 4 input taps (di, dj) in {0,1}^2, t = 2*di + dj.
    Cols: the 4 output phases (a, b) in {0,1}^2, p = 2*a + b.
      out[n, 2i+a, 2j+b, :] = sum_t x[n, i+di, j+dj, :] @ W[tCi:(t+1)Ci,
                                                            pCo:(p+1)Co]
    """
    Ci, Co, kH, kW = w_ciohw.shape
    assert kH == 3 and kW == 3
    wf = w_ciohw[:, :, ::-1, ::-1]                   # spatially flipped kernel
    zero = jnp.zeros((Ci, Co), w_ciohw.dtype)
    coeff = {(0, 0): {0: (1, 1)},
             (0, 1): {0: (1, 0), 1: (1, 2)},
             (1, 0): {0: (0, 1), 2: (2, 1)},
             (1, 1): {0: (0, 0), 1: (0, 2), 2: (2, 0), 3: (2, 2)}}
    tap_rows = []
    for t in range(4):
        phase_blocks = []
        for a in range(2):
            for b in range(2):
                rc = coeff[(a, b)].get(t)
                phase_blocks.append(zero if rc is None
                                    else wf[:, :, rc[0], rc[1]])
        tap_rows.append(jnp.concatenate(phase_blocks, axis=1))    # (Ci, 4*Co)
    return jnp.concatenate(tap_rows, axis=0)                       # (4Ci, 4Co)


def conv_transpose2d_s2(x_nhwc, w_ciohw, *, out_dtype=jnp.bfloat16):
    """nn.ConvTranspose2d(k=3, stride=2, padding=1, output_padding=1,
    bias=False).  The 4 sub-pixel taps are gathered inside the kernel from the
    once-padded NHWC input (no im2col patch tensor in HBM); the kernel also
    emits per-channel sum / sum-of-squares for the following BatchNorm."""
    n, h, w, ci = x_nhwc.shape
    ci2, co, kh, kw = w_ciohw.shape
    assert ci == ci2 and kh == 3 and kw == 3
    co4 = 4 * co
    wpad = _round_up(w + 1, 16)              # bf16 sublane-friendly row width
    xp = jnp.pad(x_nhwc.astype(jnp.bfloat16),
                 ((0, 0), (0, 1), (0, wpad - w), (0, 0)))
    wmat = _conv_transpose_weight_matrix(w_ciohw)            # (4Ci, 4Co)
    wblk = wmat.reshape(2, 2, ci, co4)                        # [di, dj, Ci, 4Co]
    wker = jnp.concatenate([wblk[:, 0], wblk[:, 1]],
                           axis=-1).astype(jnp.bfloat16)      # (2, Ci, 2*4Co)

    ti = 1                                   # rows of the input grid per step
    for cand in range(1, h + 1):
        if h % cand == 0 and cand * w <= 512:
            ti = cand
    nib = h // ti

    kern = functools.partial(_deconv_kernel, ti=ti, w_out=w)
    y, st = pl.pallas_call(
        kern,
        out_shape=(jax.ShapeDtypeStruct((n, h, w, co4), out_dtype),
                   jax.ShapeDtypeStruct((n * nib, 2, co4), jnp.float32)),
        grid=(n, nib),
        in_specs=[
            pl.BlockSpec((1, ti, wpad, ci), lambda b, i: (b, i, 0, 0)),
            pl.BlockSpec((1, 1, wpad, ci), lambda b, i: (b, (i + 1) * ti, 0, 0)),
            pl.BlockSpec((2, ci, 2 * co4), lambda b, i: (0, 0, 0)),
        ],
        out_specs=(
            pl.BlockSpec((1, ti, w, co4), lambda b, i: (b, i, 0, 0)),
            pl.BlockSpec((1, 2, co4), lambda b, i: (b * nib + i, 0, 0)),
        ),
        compiler_params=pltpu.CompilerParams(
            dimension_semantics=("parallel", "parallel"),
            vmem_limit_bytes=_VMEM_LIMIT),
        cost_estimate=pl.CostEstimate(
            flops=8 * n * h * wpad * ci * co4,
            transcendentals=0,
            bytes_accessed=(xp.size * 2 + wker.size * 2
                            + n * h * w * co4 * jnp.dtype(out_dtype).itemsize)),
    )(xp, xp, wker)

    st = jnp.sum(st, axis=0).reshape(2, 4, co).sum(axis=1)    # fold the phases
    # Sub-pixel interleave (single XLA transpose pass on the bf16/f32 output).
    # TODO(synk): fold this interleave into the consumer's tap gather.
    y = y.reshape(n, h, w, 2, 2, co).transpose(0, 1, 3, 2, 4, 5)
    y = y.reshape(n, 2 * h, 2 * w, co)
    return y, (st[0], st[1])


# ----------------------------------------------------------------------------
# Regular conv (im2col in JAX, math + stats in the Pallas matmul)
# ----------------------------------------------------------------------------
def conv2d(x_nhwc, w_oihw, stride=1, padding=1, *, want_stats=False,
           out_dtype=jnp.float32):
    """nn.Conv2d (bias=False) on NHWC input, PyTorch OIHW weights.
    TODO(synk): the kH*kW im2col patch tensor of these small 3x3/5x5 convs is
    still assembled in JAX; only the stride-2 transpose convs (the INInet
    decoder proper) gather their taps inside the kernel."""
    n, h, w, c = x_nhwc.shape
    co, ci, kh, kw = w_oihw.shape
    assert ci == c
    oh = (h + 2 * padding - kh) // stride + 1
    ow = (w + 2 * padding - kw) // stride + 1
    xp = jnp.pad(x_nhwc.astype(jnp.bfloat16),
                 ((0, 0), (padding, padding), (padding, padding), (0, 0)))
    taps = [xp[:, di:di + stride * (oh - 1) + 1:stride,
               dj:dj + stride * (ow - 1) + 1:stride, :]
            for di in range(kh) for dj in range(kw)]
    a = jnp.concatenate(taps, axis=-1).reshape(n * oh * ow, kh * kw * c)
    wmat = jnp.transpose(w_oihw, (2, 3, 1, 0)).reshape(kh * kw * ci, co)
    out, stats = pallas_matmul(a, wmat, want_stats=want_stats,
                               out_dtype=out_dtype)
    out = out.reshape(n, oh, ow, co)
    return (out, stats) if want_stats else out


# ----------------------------------------------------------------------------
# Fused BN-apply + ReLU (+ residual add), lane-dense 2-D views
# ----------------------------------------------------------------------------
def _affine_kernel(x_ref, s_ref, b_ref, o_ref, *, act):
    y = x_ref[...].astype(jnp.float32) * s_ref[...] + b_ref[...]
    if act == "relu":
        y = jnp.maximum(y, 0.0)
    o_ref[...] = y.astype(o_ref.dtype)


def _affine_add_kernel(x_ref, r_ref, s_ref, b_ref, o_ref, *, act):
    y = x_ref[...].astype(jnp.float32) * s_ref[...] + b_ref[...]
    if act == "relu":
        y = jnp.maximum(y, 0.0)
    y = y + r_ref[...].astype(jnp.float32)
    o_ref[...] = y.astype(o_ref.dtype)


def _fold_factor(m, c):
    """Fold rows into lanes when C < 128 so stores are lane-dense."""
    if c < 128 and 128 % c == 0 and m % (128 // c) == 0:
        return 128 // c
    return 1


def pallas_affine(xf, scale_f, shift_f, act="none", post_add=None,
                  out_dtype=jnp.float32):
    """out = act(x * scale + shift) [+ post_add]; f32 math, cast at the store."""
    mf, cf = xf.shape
    cap = max(16, min(_EW_MAX_TILE, _round_up(mf, 16) // 2))   # >=2 steps (v7x)
    tm, mp = _pick_tile(mf, cap, 16)
    xp = xf if mp == mf else jnp.pad(xf, ((0, mp - mf), (0, 0)))
    s2 = scale_f.reshape(1, cf).astype(jnp.float32)
    b2 = shift_f.reshape(1, cf).astype(jnp.float32)
    x_spec = pl.BlockSpec((tm, cf), lambda i: (i, 0))
    v_spec = pl.BlockSpec((1, cf), lambda i: (0, 0))
    cparams = pltpu.CompilerParams(dimension_semantics=("parallel",),
                                   vmem_limit_bytes=_VMEM_LIMIT)
    if post_add is None:
        out = pl.pallas_call(
            functools.partial(_affine_kernel, act=act),
            out_shape=jax.ShapeDtypeStruct((mp, cf), out_dtype),
            grid=(mp // tm,),
            in_specs=[x_spec, v_spec, v_spec],
            out_specs=x_spec,
            compiler_params=cparams,
        )(xp, s2, b2)
    else:
        rp = post_add if mp == mf else jnp.pad(post_add, ((0, mp - mf), (0, 0)))
        out = pl.pallas_call(
            functools.partial(_affine_add_kernel, act=act),
            out_shape=jax.ShapeDtypeStruct((mp, cf), out_dtype),
            grid=(mp // tm,),
            in_specs=[x_spec, x_spec, v_spec, v_spec],
            out_specs=x_spec,
            compiler_params=cparams,
        )(xp, rp, s2, b2)
    return out[:mf]


def batchnorm_act(x_nhwc, gamma, beta, ch_sum, ch_sqsum, count, act="relu",
                  post_add=None, out_dtype=jnp.bfloat16, eps=1e-5):
    """Training-mode BatchNorm2d + activation (+ fused residual add), using the
    per-channel sum / sum-of-squares emitted by the producing conv kernel.
    Note: single-pass E[x^2]-E[x]^2 variance in f32, clamped at 0."""
    n, h, w, c = x_nhwc.shape
    mean = ch_sum / count
    var = jnp.maximum(ch_sqsum / count - mean * mean, 0.0)
    scale = gamma * jax.lax.rsqrt(var + eps)
    shift = beta - mean * scale
    m = n * h * w
    f = _fold_factor(m, c)
    xf = x_nhwc.reshape(m // f, f * c)
    rf = None if post_add is None else post_add.reshape(m // f, f * c)
    out = pallas_affine(xf, jnp.tile(scale, f), jnp.tile(shift, f),
                        act=act, post_add=rf, out_dtype=out_dtype)
    return out.reshape(n, h, w, c)


def conv_bn_relu(x, w, gamma, beta, stride=1, padding=1, post_add=None,
                 out_dtype=jnp.bfloat16):
    y, (s, q) = conv2d(x, w, stride=stride, padding=padding, want_stats=True,
                       out_dtype=jnp.bfloat16)
    n, oh, ow, _ = y.shape
    return batchnorm_act(y, gamma, beta, s, q, n * oh * ow, act="relu",
                         post_add=post_add, out_dtype=out_dtype)


def deconv_bn_relu(x, w, gamma, beta, post_add=None, out_dtype=jnp.bfloat16):
    y, (s, q) = conv_transpose2d_s2(x, w, out_dtype=jnp.bfloat16)
    n, oh, ow, _ = y.shape
    return batchnorm_act(y, gamma, beta, s, q, n * oh * ow, act="relu",
                         post_add=post_add, out_dtype=out_dtype)


# ----------------------------------------------------------------------------
# Model
# ----------------------------------------------------------------------------
# TODO(synk): `pretrained_net` is an external dependency of INInet (any
# backbone producing 5 feature maps at 1/2..1/32 resolution with
# 64/64/128/256/512 channels).  A small strided-conv + BN + ReLU encoder built
# from the same Pallas kernels is used as a stand-in here.
def pretrained_net(x_nhwc, p):
    feats = []
    h = x_nhwc
    for i in range(1, 6):
        h = conv_bn_relu(h, p[f"f{i}_w"], p[f"f{i}_g"], p[f"f{i}_b"],
                         stride=2, padding=1)
        feats.append(h)
    return tuple(feats)          # x1 (1/2, 64ch) ... x5 (1/32, 512ch)


def ininet_forward(params, x_nchw):
    p = params
    x = jnp.transpose(x_nchw, (0, 2, 3, 1))
    x1, x2, x3, x4, x5 = pretrained_net(x, p)

    # Decoder.  Skip-adds whose producer has exactly one consumer are fused
    # into the producing BN+ReLU kernel (post_add=...); the three remaining
    # adds are left to XLA (they fuse into the next deconv's input padding).
    a5 = deconv_bn_relu(x5, p["conv5"], p["bn5_g"], p["bn5_b"], post_add=x4)
    xd = deconv_bn_relu(x5, p["conv_d0"], p["bn_d0_g"], p["bn_d0_b"])
    x6 = deconv_bn_relu(a5, p["conv6"], p["bn6_g"], p["bn6_b"])
    xd = deconv_bn_relu(xd, p["conv_d1"], p["bn_d1_g"], p["bn_d1_b"],
                        post_add=x6)
    x7 = deconv_bn_relu(x6 + x3, p["conv7"], p["bn7_g"], p["bn7_b"])
    xd = deconv_bn_relu(xd, p["conv_d2"], p["bn_d2_g"], p["bn_d2_b"],
                        post_add=x7)
    x8 = deconv_bn_relu(x7 + x2, p["conv8"], p["bn8_g"], p["bn8_b"])
    xd = deconv_bn_relu(xd, p["conv_d3"], p["bn_d3_g"], p["bn_d3_b"],
                        post_add=x8)
    x9 = deconv_bn_relu(x8 + x1, p["conv9"], p["bn9_g"], p["bn9_b"])
    xd = deconv_bn_relu(xd, p["conv_d4"], p["bn_d4_g"], p["bn_d4_b"],
                        post_add=x9)

    xn2 = conv_bn_relu(x9, p["convadd"], p["bnadd_g"], p["bnadd_b"],
                       stride=1, padding=1)
    x_1 = conv2d(xn2, p["conv10"], stride=2, padding=2,
                 out_dtype=jnp.float32)
    xd2 = conv_bn_relu(xd, p["conv_d5"], p["bn_d5_g"], p["bn_d5_b"],
                       stride=1, padding=1)
    x_2 = conv2d(xd2, p["convd"], stride=2, padding=2,
                 out_dtype=jnp.float32)

    return jnp.transpose(x_1, (0, 3, 1, 2)), jnp.transpose(x_2, (0, 3, 1, 2))


# ----------------------------------------------------------------------------
# Deterministic parameter construction
# ----------------------------------------------------------------------------
def init_params(key):
    keys = iter(jax.random.split(key, 64))
    nk = lambda: next(keys)

    def conv_w(co, ci, k):
        std = (2.0 / (ci * k * k)) ** 0.5
        return jax.random.normal(nk(), (co, ci, k, k), jnp.float32) * std

    def convT_w(ci, co, k=3):
        std = (2.0 / (co * k * k)) ** 0.5
        return jax.random.normal(nk(), (ci, co, k, k), jnp.float32) * std

    ones = lambda c: jnp.ones((c,), jnp.float32)
    zeros = lambda c: jnp.zeros((c,), jnp.float32)

    params = {}
    # stand-in backbone (see TODO above)
    for i, (ci, co) in enumerate([(3, 64), (64, 64), (64, 128),
                                  (128, 256), (256, 512)], start=1):
        params[f"f{i}_w"] = conv_w(co, ci, 3)
        params[f"f{i}_g"] = ones(co)
        params[f"f{i}_b"] = zeros(co)
    # INInet decoder
    for name, ci, co, bnn in [("conv5", 512, 256, "bn5"),
                              ("conv6", 256, 128, "bn6"),
                              ("conv7", 128, 64, "bn7"),
                              ("conv8", 64, 64, "bn8"),
                              ("conv9", 64, 32, "bn9"),
                              ("conv_d0", 512, 256, "bn_d0"),
                              ("conv_d1", 256, 128, "bn_d1"),
                              ("conv_d2", 128, 64, "bn_d2"),
                              ("conv_d3", 64, 64, "bn_d3"),
                              ("conv_d4", 64, 32, "bn_d4")]:
        params[name] = convT_w(ci, co)
        params[bnn + "_g"] = ones(co)
        params[bnn + "_b"] = zeros(co)
    params["convadd"] = conv_w(16, 32, 3)
    params["bnadd_g"] = ones(16); params["bnadd_b"] = zeros(16)
    params["conv_d5"] = conv_w(16, 32, 3)
    params["bn_d5_g"] = ones(16); params["bn_d5_b"] = zeros(16)
    # conv10 / convd weights are zero-initialised (bias=False) in the module.
    params["conv10"] = jnp.zeros((3, 16, 5, 5), jnp.float32)
    params["convd"] = jnp.zeros((1, 16, 5, 5), jnp.float32)
    return params


# ----------------------------------------------------------------------------
if __name__ == "__main__":
    key = jax.random.PRNGKey(0)
    kp, kx, ka, kb, kc, kd, ke, kf = jax.random.split(key, 8)

    # --- self-checks of the Pallas conv lowerings vs. lax references ---------
    def ref_conv2d(x, w, stride, padding):
        w_hwio = jnp.transpose(w, (2, 3, 1, 0))
        return jax.lax.conv_general_dilated(
            x, w_hwio, window_strides=(stride, stride),
            padding=((padding, padding), (padding, padding)),
            dimension_numbers=("NHWC", "HWIO", "NHWC"))

    def ref_conv_transpose(x, w):
        w_hwio = jnp.transpose(w, (2, 3, 0, 1))[::-1, ::-1, :, :]
        return jax.lax.conv_general_dilated(
            x, w_hwio, window_strides=(1, 1),
            padding=((1, 2), (1, 2)), lhs_dilation=(2, 2),
            dimension_numbers=("NHWC", "HWIO", "NHWC"))

    xt = jax.random.normal(ka, (2, 10, 10, 8), jnp.float32)
    wt = jax.random.normal(kb, (6, 8, 3, 3), jnp.float32) * 0.1
    y1 = conv2d(xt, wt, 1, 1, out_dtype=jnp.float32)
    assert float(jnp.max(jnp.abs(y1 - ref_conv2d(xt, wt, 1, 1)))) < 1e-1
    wt5 = jax.random.normal(kc, (4, 8, 5, 5), jnp.float32) * 0.1
    y5 = conv2d(xt, wt5, 2, 2, out_dtype=jnp.float32)
    assert float(jnp.max(jnp.abs(y5 - ref_conv2d(xt, wt5, 2, 2)))) < 1e-1

    # fused-tap transpose conv at decoder-like dims
    xq = jax.random.normal(kd, (2, 8, 8, 64), jnp.float32)
    wq = jax.random.normal(ke, (64, 32, 3, 3), jnp.float32) * 0.05
    yq, (sq_s, sq_q) = conv_transpose2d_s2(xq, wq, out_dtype=jnp.float32)
    assert float(jnp.max(jnp.abs(yq - ref_conv_transpose(xq, wq)))) < 1e-1

    # BN(+ReLU) applied with the kernel-produced stats matches a 2-pass ref
    g32 = jnp.ones((32,), jnp.float32)
    b32 = jnp.zeros((32,), jnp.float32)
    cnt = yq.shape[0] * yq.shape[1] * yq.shape[2]
    bn_out = batchnorm_act(yq, g32, b32, sq_s, sq_q, cnt, act="relu",
                           out_dtype=jnp.float32)
    mu = jnp.mean(yq, axis=(0, 1, 2))
    va = jnp.mean((yq - mu) ** 2, axis=(0, 1, 2))
    ref_bn = jnp.maximum((yq - mu) / jnp.sqrt(va + 1e-5), 0.0)
    assert float(jnp.max(jnp.abs(bn_out - ref_bn))) < 1e-2

    # --- full INInet forward --------------------------------------------------
    params = init_params(kp)
    x = jax.random.normal(kx, (2, 3, 64, 64), jnp.float32)
    fwd = jax.jit(ininet_forward)
    x_1, x_2 = fwd(params, x)
    jax.block_until_ready((x_1, x_2))

    assert x_1.shape == (2, 3, 32, 32), x_1.shape
    assert x_2.shape == (2, 1, 32, 32), x_2.shape
    assert bool(jnp.all(jnp.isfinite(x_1))) and bool(jnp.all(jnp.isfinite(x_2)))
    # conv10 / convd weights are zero-initialised (bias=False) => exact zeros.
    assert bool(jnp.all(x_1 == 0.0)) and bool(jnp.all(x_2 == 0.0))

    print("KERNEL_OK")
</pallas_src>

<mosaic_0001>
module attributes {stable_mosaic.version = 11 : i64} {
  func.func @_mm_kernel(%arg0: i32, %arg1: memref<200x80xbf16, #tpu.memory_space<vmem>>, %arg2: memref<80x128xbf16, #tpu.memory_space<vmem>>, %arg3: memref<200x128xf32, #tpu.memory_space<vmem>>) attributes {dimension_semantics = [#tpu.dimension_semantics<parallel>], iteration_bounds = array<i64: 1>, scalar_prefetch = 0 : i64, scratch_operands = 0 : i64, tpu.core_type = #tpu.core_type<tc>, window_params = [{transform_indices = @transform_0, window_bounds = array<i64: 200, 80>}, {pipeline_mode = #tpu.pipeline_mode<synchronous>, transform_indices = @transform_1, window_bounds = array<i64: 80, 128>}, {transform_indices = @transform_2, window_bounds = array<i64: 200, 128>}]} {
    %c0 = arith.constant 0 : index
    %c0_0 = arith.constant 0 : index
    %0 = vector.load %arg1[%c0, %c0_0] : memref<200x80xbf16, #tpu.memory_space<vmem>>, vector<200x80xbf16>
    %c0_1 = arith.constant 0 : index
    %c0_2 = arith.constant 0 : index
    %1 = vector.load %arg2[%c0_1, %c0_2] : memref<80x128xbf16, #tpu.memory_space<vmem>>, vector<80x128xbf16>
    %cst = arith.constant dense<0.000000e+00> : vector<200x128xf32>
    %2 = tpu.matmul %0, %1, %cst {dimension_numbers = #tpu.dot_dimension_numbers<[1], [0], [0], [1], [0, 0, 1, 1], [], []>} : vector<200x80xbf16>, vector<80x128xbf16>, vector<200x128xf32> -> vector<200x128xf32>
    %c0_3 = arith.constant 0 : index
    %c0_4 = arith.constant 0 : index
    %3 = vector.load %arg3[%c0_3, %c0_4] : memref<200x128xf32, #tpu.memory_space<vmem>>, vector<200x128xf32>
    tpu.vector_store %arg3[%c0_3, %c0_4], %2 {strides = array<i32>} : memref<200x128xf32, #tpu.memory_space<vmem>>, vector<200x128xf32>,
    return
  }
  func.func @transform_0(%arg0: i32) -> (i32, i32) {
    %c0_i32 = arith.constant 0 : i32
    %c0_i32_0 = arith.constant 0 : i32
    return %arg0, %c0_i32 : i32, i32
  }
  func.func @transform_1(%arg0: i32) -> (i32, i32) {
    %c0_i32 = arith.constant 0 : i32
    %c0_i32_0 = arith.constant 0 : i32
    %c0_i32_1 = arith.constant 0 : i32
    return %c0_i32, %c0_i32_0 : i32, i32
  }
  func.func @transform_2(%arg0: i32) -> (i32, i32) {
    %c0_i32 = arith.constant 0 : i32
    %c0_i32_0 = arith.constant 0 : i32
    return %arg0, %c0_i32 : i32, i32
  }
}

</mosaic_0001>

<bundles_post_ra>
// kernel: tpu_custom_call.1
= control target key start
LH: loop header
LB: loop body
LE: loop exit
PB: predicated region body
PF: predicated region fallthrough
CT: control target
= control target key end

     0   :  { %s527_s0 = inlined_call_operand.vmem [shape: bf16[200,80], index: 0, kind: input, shape index: {}]   ;;  %s528_s1 = inlined_call_operand.vmem [shape: bf16[80,128], index: 1, kind: input, shape index: {}]   ;;  %s529_s2 = inlined_call_operand.hbm [shape: f32[200,128], index: 2, kind: output, shape index: {}]  }
   0x1   :  { %v394_v0 = vld [vmem:[%s528_s1 + $0x20] sm:$0xff]  ;;  %v393_v1 = vld [vmem:[%s528_s1 + $0x18] sm:$0xff] }
   0x2   :  { %396 = vmatpush.bf16.msra.mxu2 %v394_v0  ;;  %397 = vmatpush.bf16.msra.mxu3 %v394_v0 }
   0x3   :  { %184 = vmatpush.bf16.msra.mxu0 %v394_v0  ;;  %395 = vmatpush.bf16.msra.mxu1 %v394_v0 }
   0x4   :  { %7 = vsyncpa [#allocation3], 0  ;;  %v392_v2 = vld [vmem:[%s528_s1 + $0x10] sm:$0xff]  ;;  %v391_v3 = vld [vmem:[%s528_s1 + $0x8] sm:$0xff]  ;;  %vm141_vm0 = vcmask 654336   ;;  %s285_s19 = sshll.u32 %s529_s2, 4  ;;  %s286_s19 = int_to_ptr.hbm [resolvable:$true] %s285_s19 }
   0x5   :  { %v390_v4 = vld [vmem:[%s528_s1] sm:$0xff]  ;;  %v384_v5 = vld [vmem:[%s527_s0 + $0x30] sm:$0xff]  ;;  %v381_v8 = vld [vmem:[%s527_s0 + $0x18] sm:$0xff]  ;;  %s440_s20 = smov 128   ;;  %s441_s21 = smov 8  }
   0x6   :  { %399 = vmatpush.bf16.msra.mxu2 %v393_v1  ;;  %400 = vmatpush.bf16.msra.mxu3 %v393_v1  ;;  %v388_v6 = vld [vmem:[%s527_s0 + $0x50] sm:$0xff]  ;;  %v378_v7 = vld [vmem:[%s527_s0] sm:$0xff]  ;;  %v385_v9 = vld [vmem:[%s527_s0 + $0x38] sm:$0xff] }
   0x7   :  { %185 = vmatpush.bf16.msra.mxu0 %v393_v1  ;;  %398 = vmatpush.bf16.msra.mxu1 %v393_v1  ;;  %v389_v10 = vld [vmem:[%s527_s0 + $0x58] sm:$0xff]  ;;  %v379_v11 = vld [vmem:[%s527_s0 + $0x8] sm:$0xff]  ;;  %v382_v12 = vld [vmem:[%s527_s0 + $0x20] sm:$0xff] }
   0x8   :  { %v37_v13 = vld [vmem:[%s527_s0 + $0x60] sm:$0xf]  ;;  %v380_v17 = vld [vmem:[%s527_s0 + $0x10] sm:$0xff]  ;;  %v383_v18 = vld [vmem:[%s527_s0 + $0x28] sm:$0xff] }
   0x9   :  { %v97_v14 = vunpack.c.l.b16 %v37_v13  ;;  %v386_v15 = vld [vmem:[%s527_s0 + $0x40] sm:$0xff]  ;;  %v387_v19 = vld [vmem:[%s527_s0 + $0x48] sm:$0xff]  ;;  %s439_s0 = smov [#allocation2]  }
   0xa   :  { %402 = vmatpush.bf16.msra.mxu2 %v392_v2  ;;  %403 = vmatpush.bf16.msra.mxu3 %v392_v2  ;;  %s283_s16 = sshll.u32 %s439_s0, 4  ;;  %s284_s16 = int_to_ptr.vmem [resolvable:$true] %s283_s16 }
   0xb   :  { %186 = vmatpush.bf16.msra.mxu0 %v392_v2  ;;  %401 = vmatpush.bf16.msra.mxu1 %v392_v2  ;;  %v110_v16 = vpack.c.b16 %v97_v14, %v97_v14 }
   0xe   :  { %405 = vmatpush.bf16.msra.mxu2 %v391_v3  ;;  %406 = vmatpush.bf16.msra.mxu3 %v391_v3 }
   0xf   :  { %187 = vmatpush.bf16.msra.mxu0 %v391_v3  ;;  %404 = vmatpush.bf16.msra.mxu1 %v391_v3 }
  0x12   :  { %408 = vmatpush.bf16.msra.mxu2 %v390_v4  ;;  %409 = vmatpush.bf16.msra.mxu3 %v390_v4 }
  0x13   :  { %188 = vmatpush.bf16.msra.mxu0 %v390_v4  ;;  %407 = vmatpush.bf16.msra.mxu1 %v390_v4 }
  0x15   :  { %371 = vmatmul.msk.bf16.vlgmr.msra.gmra.mxu2 %vm141_vm0, %v384_v5  ;;  %375 = vmatmul.msk.bf16.vlgmr.msra.gmra.mxu3 %vm141_vm0, %v388_v6 }
  0x16   :  { %365 = vmatmul.msk.bf16.vlgmr.msra.gmra.mxu0 %vm141_vm0, %v378_v7  ;;  %368 = vmatmul.msk.bf16.vlgmr.msra.gmra.mxu1 %vm141_vm0, %v381_v8 }
  0x25   :  { %372 = vmatmul.msk.bf16.gmra.mxu2 %vm141_vm0, %v385_v9  ;;  %376 = vmatmul.msk.bf16.gmra.mxu3 %vm141_vm0, %v389_v10 }
  0x26   :  { %366 = vmatmul.msk.bf16.gmra.mxu0 %vm141_vm0, %v379_v11  ;;  %369 = vmatmul.msk.bf16.gmra.mxu1 %vm141_vm0, %v382_v12 }
  0x35   :  { %373 = vmatmul.msk.bf16.gmra.mxu2 %vm141_vm0, %v386_v15  ;;  %377 = vmatmul.msk.bf16.gmra.mxu3 %vm141_vm0, %v110_v16 }
  0x36   :  { %367 = vmatmul.msk.bf16.gmra.mxu0 %vm141_vm0, %v380_v17  ;;  %370 = vmatmul.msk.bf16.gmra.mxu1 %vm141_vm0, %v383_v18 }
  0x45   :  { %374 = vmatmul.msk.bf16.gmra.mxu2 %vm141_vm0, %v387_v19 }
  0x93   :  { %v190_v20 = vpop.f32.mrf.mxu0  ;;  %v205_v21 = vpop.f32.mrf.mxu1 }
  0x94   :  { %254 = vst [vmem:[#allocation2] sm:$0xff] %v190_v20 }
  0x95   :  { %260 = vst [vmem:[#allocation2 + $0x30] sm:$0xff] %v205_v21 }
  0x98   :  { %v220_v22 = vpop.f32.mrf.mxu2  ;;  %v240_v23 = vpop.f32.mrf.mxu3 }
  0x99   :  { %266 = vst [vmem:[#allocation2 + $0x60] sm:$0xff] %v220_v22 }
  0x9a   :  { %274 = vst [vmem:[#allocation2 + $0xa0] sm:$0xff] %v240_v23 }
  0x9b   :  { %v192_v24 = vpop.f32.mrf.mxu0  ;;  %v207_v25 = vpop.f32.mrf.mxu1 }
  0x9c   :  { %255 = vst [vmem:[#allocation2 + $0x8] sm:$0xff] %v192_v24 }
  0x9d   :  { %261 = vst [vmem:[#allocation2 + $0x38] sm:$0xff] %v207_v25 }
  0xa0   :  { %v222_v26 = vpop.f32.mrf.mxu2  ;;  %v242_v27 = vpop.f32.mrf.mxu3 }
  0xa1   :  { %267 = vst [vmem:[#allocation2 + $0x68] sm:$0xff] %v222_v26 }
  0xa2   :  { %275 = vst [vmem:[#allocation2 + $0xa8] sm:$0xff] %v242_v27 }
  0xa3   :  { %v195_v28 = vpop.f32.mrf.mxu0  ;;  %v210_v29 = vpop.f32.mrf.mxu1 }
  0xa4   :  { %256 = vst [vmem:[#allocation2 + $0x10] sm:$0xff] %v195_v28 }
  0xa5   :  { %262 = vst [vmem:[#allocation2 + $0x40] sm:$0xff] %v210_v29 }
  0xa8   :  { %v225_v30 = vpop.f32.mrf.mxu2  ;;  %v245_v31 = vpop.f32.mrf.mxu3 }
  0xa9   :  { %268 = vst [vmem:[#allocation2 + $0x70] sm:$0xff] %v225_v30 }
  0xaa   :  { %276 = vst [vmem:[#allocation2 + $0xb0] sm:$0xff] %v245_v31 }
  0xab   :  { %v197_v32 = vpop.f32.mrf.mxu0  ;;  %v212_v33 = vpop.f32.mrf.mxu1 }
  0xac   :  { %257 = vst [vmem:[#allocation2 + $0x18] sm:$0xff] %v197_v32 }
  0xad   :  { %263 = vst [vmem:[#allocation2 + $0x48] sm:$0xff] %v212_v33 }
  0xb0   :  { %v227_v34 = vpop.f32.mrf.mxu2  ;;  %v247_v35 = vpop.f32.mrf.mxu3 }
  0xb1   :  { %269 = vst [vmem:[#allocation2 + $0x78] sm:$0xff] %v227_v34 }
  0xb2   :  { %277 = vst [vmem:[#allocation2 + $0xb8] sm:$0xff] %v247_v35 }
  0xb3   :  { %v200_v36 = vpop.f32.mrf.mxu0  ;;  %v215_v37 = vpop.f32.mrf.mxu1 }
  0xb4   :  { %258 = vst [vmem:[#allocation2 + $0x20] sm:$0xff] %v200_v36 }
  0xb5   :  { %264 = vst [vmem:[#allocation2 + $0x50] sm:$0xff] %v215_v37 }
  0xb8   :  { %v230_v38 = vpop.f32.mrf.mxu2  ;;  %v250_v39 = vpop.f32.mrf.mxu3 }
  0xb9   :  { %270 = vst [vmem:[#allocation2 + $0x80] sm:$0xff] %v230_v38 }
  0xba   :  { %278 = vst [vmem:[#allocation2 + $0xc0] sm:$0xff] %v250_v39 }
  0xbb   :  { %v202_v40 = vpop.f32.mrf.mxu0  ;;  %v217_v41 = vpop.f32.mrf.mxu1 }
  0xbc   :  { %259 = vst [vmem:[#allocation2 + $0x28] sm:$0xff] %v202_v40 }
  0xbd   :  { %265 = vst [vmem:[#allocation2 + $0x58] sm:$0xff] %v217_v41 }
  0xc0   :  { %v232_v42 = vpop.f32.mrf.mxu2  ;;  %v252_v43 = vpop.f32.mrf.mxu3 }
  0xc1   :  { %271 = vst [vmem:[#allocation2 + $0x88] sm:$0xff] %v232_v42 }
  0xc8   :  { %v235_v44 = vpop.f32.mrf.mxu2 }
  0xc9   :  { %272 = vst [vmem:[#allocation2 + $0x90] sm:$0xff] %v235_v44 }
  0xd0   :  { %v237_v45 = vpop.f32.mrf.mxu2 }
  0xd1   :  { %273 = vst [vmem:[#allocation2 + $0x98] sm:$0xff] %v237_v45 }
  0xd2   :  { %291 = dma.vmem_to_hbm [thread:$0]  %s284_s16, 3200, %s286_s19, [#allocation3], %s440_s20, %s440_s20, %s441_s21  }
  0xd3   :  { %437 = dma.done.wait [#allocation3], 3200  }
  0xd4   :  { %438 = vsyncadd [#allocation3], 4294964096 }
  0xd5   :  { %296 = vsyncpa [#allocation3], 1 }

</bundles_post_ra>
